<compile_context>
chip_gen: v7x
topology: tpu7x:2x2x1
jax: 0.10.0
libtpu: 0.0.40
codegen_flags: <defaults>
</compile_context>

<pallas_src>
import math
import functools

import jax
import jax.numpy as jnp
from jax.experimental import pallas as pl
from jax.experimental.pallas import tpu as pltpu


# ----------------------------- kernel ----------------------------------------


def _agg_logsoftmax_kernel(adj_ref, sup_ref, o_ref, acc_ref, *, tk):
    """acc += adj_tile @ support[k-slice]; log_softmax epilogue on last k."""
    k = pl.program_id(1)

    @pl.when(k == 0)
    def _init():
        acc_ref[...] = jnp.zeros_like(acc_ref)

    # support is VMEM-resident for the whole grid; slice the k-th window.
    start = pl.multiple_of(k * tk, tk)
    sup_blk = sup_ref[pl.ds(start, tk), :]

    # MXU matmul with f32 accumulation.
    acc_ref[...] += jnp.dot(
        adj_ref[...], sup_blk, preferred_element_type=jnp.float32
    )

    @pl.when(k == pl.num_programs(1) - 1)
    def _finalize():
        out = acc_ref[...]
        m = jnp.max(out, axis=1, keepdims=True)                      # XLU
        s = out - m
        lse = jnp.log(jnp.sum(jnp.exp(s), axis=1, keepdims=True))    # EUP + XLU
        o_ref[...] = (s - lse).astype(o_ref.dtype)


# ----------------------------- tiling -----------------------------------------


def _round_up(a, b):
    return ((a + b - 1) // b) * b


def _largest_divisor_tile(n_pad, cap, prefer_multiple_blocks=False):
    """Largest multiple of 128 that divides n_pad and is <= cap.

    With prefer_multiple_blocks, prefer the largest such tile yielding >= 2
    blocks (so the 'parallel' row axis can span both v7x TensorCores); fall
    back to the single full-extent block if that is the only divisor.
    """
    fallback = None
    for cand in range(min(cap, n_pad), 0, -128):
        if n_pad % cand == 0:
            if not prefer_multiple_blocks or n_pad // cand >= 2:
                return cand
            if fallback is None:
                fallback = cand
    return fallback if fallback is not None else n_pad


def _pick_tiles(n):
    """Return (n_pad, row_tile tm, reduction_tile tk)."""
    n_pad = _round_up(max(n, 1), 128)        # cap padding overhead at ~1.5x
    tm = _largest_divisor_tile(n_pad, 512, prefer_multiple_blocks=True)
    tk = _largest_divisor_tile(n_pad, 2048)
    return n_pad, tm, tk


# ----------------------------- wrapper ----------------------------------------


@functools.partial(jax.jit, static_argnames=("use_bf16",))
def exact1_forward(x, adj, weight, *, use_bf16=True):
    """log_softmax(adj @ (x @ W), axis=1).

    use_bf16=True (default) streams adj / support in bf16 (the kernel is
    adj-HBM-bound, so this is ~2x on every TPU generation); accumulation and
    the log_softmax stay f32.  Pass use_bf16=False for f32-exact results.
    """
    n, _ = x.shape
    out_dim = weight.shape[1]
    n_pad, tm, tk = _pick_tiles(n)
    pad_n = n_pad - n

    compute_dtype = jnp.bfloat16 if use_bf16 else jnp.float32

    # support = x @ W is tiny (N x in_dim x out_dim): plain XLA dot, no extra
    # pallas_call launch / HBM round trip.  Padded rows are zero so padded
    # adjacency columns contribute nothing.
    support = jnp.dot(
        x.astype(compute_dtype), weight.astype(compute_dtype),
        preferred_element_type=jnp.float32,
    ).astype(compute_dtype)
    if pad_n:
        support = jnp.pad(support, ((0, pad_n), (0, 0)))

    # Cast adj BEFORE padding so the (at most one) materialized copy moves
    # half the bytes in bf16; no pad pass at all when N % 128 == 0.
    adj_c = adj.astype(compute_dtype)
    adj_p = jnp.pad(adj_c, ((0, pad_n), (0, pad_n))) if pad_n else adj_c

    kernel = functools.partial(_agg_logsoftmax_kernel, tk=tk)

    out_p = pl.pallas_call(
        kernel,
        out_shape=jax.ShapeDtypeStruct((n_pad, out_dim), jnp.float32),
        grid_spec=pltpu.PrefetchScalarGridSpec(
            num_scalar_prefetch=0,
            grid=(n_pad // tm, n_pad // tk),
            in_specs=[
                # Streaming adjacency tile (the dominant HBM traffic).
                pl.BlockSpec((tm, tk), lambda i, k: (i, k)),
                # Whole support resident in VMEM for the entire grid.
                pl.BlockSpec((n_pad, out_dim), lambda i, k: (0, 0)),
            ],
            out_specs=pl.BlockSpec((tm, out_dim), lambda i, k: (i, 0)),
            scratch_shapes=[pltpu.VMEM((tm, out_dim), jnp.float32)],
        ),
        compiler_params=pltpu.CompilerParams(
            dimension_semantics=("parallel", "arbitrary"),
            # Worst case (512x2048 f32 adj, double-buffered) + resident
            # support + acc stays well under 32 MiB, which is safe on
            # v5e / v6e / v7x alike.
            vmem_limit_bytes=32 * 1024 * 1024,
        ),
    )(adj_p, support)

    return out_p[:n]


# ----------------------------- reference --------------------------------------


def reference_forward(x, adj, weight, compute_dtype=jnp.float32):
    support = jnp.dot(
        x.astype(compute_dtype), weight.astype(compute_dtype),
        preferred_element_type=jnp.float32,
    ).astype(compute_dtype)
    out = jnp.dot(
        adj.astype(compute_dtype), support, preferred_element_type=jnp.float32
    )
    return jax.nn.log_softmax(out, axis=1)


# ----------------------------- main --------------------------------------------


if __name__ == "__main__":
    # Small shapes consistent with the module: N nodes, in_dim, out_dim.
    N, IN_DIM, HID_DIM, OUT_DIM = 8, 32, 16, 16
    dropout = 0.5  # unused in forward

    key = jax.random.PRNGKey(0)
    kx, kadj, kw, kb = jax.random.split(key, 4)

    x = jax.random.normal(kx, (N, IN_DIM), dtype=jnp.float32)
    adj = jax.random.uniform(kadj, (N, N), dtype=jnp.float32)

    # Deterministic parameter init mirroring reset_parameters():
    # uniform(-stdv, stdv) with stdv = 1/sqrt(out_features)
    stdv = 1.0 / math.sqrt(OUT_DIM)
    weight = jax.random.uniform(
        kw, (IN_DIM, OUT_DIM), dtype=jnp.float32, minval=-stdv, maxval=stdv
    )
    bias = jax.random.uniform(
        kb, (OUT_DIM,), dtype=jnp.float32, minval=-stdv, maxval=stdv
    )  # defined in the module but never used in forward()

    # 1) Tiny case, f32-exact path (single 128-block grid).
    out = jax.block_until_ready(exact1_forward(x, adj, weight, use_bf16=False))
    ref = reference_forward(x, adj, weight)
    assert out.shape == (N, OUT_DIM)
    assert jnp.allclose(out, ref, atol=1e-5, rtol=1e-5), "mismatch (small, f32)"

    # 2) Medium case, f32: N=600 -> n_pad=640, tm=128 (5 row tiles), tk=640.
    N2, IN2 = 600, 48
    kx2, kadj2, kw2 = jax.random.split(jax.random.PRNGKey(1), 3)
    x2 = jax.random.normal(kx2, (N2, IN2), dtype=jnp.float32)
    adj2 = jax.random.uniform(kadj2, (N2, N2), dtype=jnp.float32)
    w2 = jax.random.uniform(
        kw2, (IN2, OUT_DIM), dtype=jnp.float32, minval=-stdv, maxval=stdv
    )
    out2 = jax.block_until_ready(exact1_forward(x2, adj2, w2, use_bf16=False))
    ref2 = reference_forward(x2, adj2, w2)
    assert out2.shape == (N2, OUT_DIM)
    assert jnp.allclose(out2, ref2, atol=1e-3, rtol=1e-3), "mismatch (tiled, f32)"

    # 3) Medium case, default bf16 stream vs bf16-matched reference.
    out2_bf = jax.block_until_ready(exact1_forward(x2, adj2, w2))
    ref2_bf = reference_forward(x2, adj2, w2, compute_dtype=jnp.bfloat16)
    assert jnp.allclose(out2_bf, ref2_bf, atol=2e-2, rtol=2e-2), "mismatch (bf16)"

    # 4) Larger case exercising padding (2500 -> 2560), multi-tile rows
    #    (tm=512, 5 tiles) and a real reduction loop (tk=1280, 2 k-steps),
    #    with the default bf16 adj stream.
    N3, IN3 = 2500, 48
    kx3, kadj3, kw3 = jax.random.split(jax.random.PRNGKey(2), 3)
    x3 = jax.random.normal(kx3, (N3, IN3), dtype=jnp.float32)
    adj3 = jax.random.uniform(kadj3, (N3, N3), dtype=jnp.float32)
    w3 = jax.random.uniform(
        kw3, (IN3, OUT_DIM), dtype=jnp.float32, minval=-stdv, maxval=stdv
    )
    out3 = jax.block_until_ready(exact1_forward(x3, adj3, w3))
    ref3 = reference_forward(x3, adj3, w3, compute_dtype=jnp.bfloat16)
    assert out3.shape == (N3, OUT_DIM)
    assert jnp.allclose(out3, ref3, atol=2e-2, rtol=2e-2), "mismatch (large, bf16)"

    print("KERNEL_OK")
</pallas_src>

<mosaic_0001>
module attributes {stable_mosaic.version = 11 : i64} {
  func.func @_agg_logsoftmax_kernel(%arg0: i32, %arg1: i32, %arg2: memref<128x128xf32, #tpu.memory_space<vmem>>, %arg3: memref<128x16xf32, #tpu.memory_space<vmem>>, %arg4: memref<128x16xf32, #tpu.memory_space<vmem>>, %arg5: memref<128x16xf32, #tpu.memory_space<vmem>>) attributes {dimension_semantics = [#tpu.dimension_semantics<parallel>, #tpu.dimension_semantics<arbitrary>], iteration_bounds = array<i64: 1, 1>, scalar_prefetch = 0 : i64, scratch_operands = 1 : i64, tpu.core_type = #tpu.core_type<tc>, window_params = [{transform_indices = @transform_0, window_bounds = array<i64: 128, 128>}, {pipeline_mode = #tpu.pipeline_mode<synchronous>, transform_indices = @transform_1, window_bounds = array<i64: 128, 16>}, {transform_indices = @transform_2, window_bounds = array<i64: 128, 16>}]} {
    %c0_i32 = arith.constant 0 : i32
    %0 = arith.cmpi eq, %arg1, %c0_i32 : i32
    %1 = arith.extui %0 : i1 to i32
    %c0_i32_0 = arith.constant 0 : i32
    %2 = arith.cmpi ne, %1, %c0_i32_0 : i32
    scf.if %2 {
      %cst_9 = arith.constant 0.000000e+00 : f32
      %15 = vector.broadcast %cst_9 : f32 to vector<128x16xf32>
      %c0_10 = arith.constant 0 : index
      %c0_11 = arith.constant 0 : index
      %16 = vector.load %arg5[%c0_10, %c0_11] : memref<128x16xf32, #tpu.memory_space<vmem>>, vector<128x16xf32>
      tpu.vector_store %arg5[%c0_10, %c0_11], %15 {strides = array<i32>} : memref<128x16xf32, #tpu.memory_space<vmem>>, vector<128x16xf32>,
    } else {
    }
    %c128_i32 = arith.constant 128 : i32
    %3 = arith.muli %arg1, %c128_i32 : i32
    %4 = tpu.assume_multiple %3, 128 : i32
    %5 = arith.index_cast %4 : i32 to index
    %c0 = arith.constant 0 : index
    %6 = vector.load %arg3[%5, %c0] : memref<128x16xf32, #tpu.memory_space<vmem>>, vector<128x16xf32>
    %c0_1 = arith.constant 0 : index
    %c0_2 = arith.constant 0 : index
    %7 = vector.load %arg5[%c0_1, %c0_2] : memref<128x16xf32, #tpu.memory_space<vmem>>, vector<128x16xf32>
    %c0_3 = arith.constant 0 : index
    %c0_4 = arith.constant 0 : index
    %8 = vector.load %arg2[%c0_3, %c0_4] : memref<128x128xf32, #tpu.memory_space<vmem>>, vector<128x128xf32>
    %cst = arith.constant dense<0.000000e+00> : vector<128x16xf32>
    %9 = tpu.matmul %8, %6, %cst {dimension_numbers = #tpu.dot_dimension_numbers<[1], [0], [0], [1], [0, 0, 1, 1], [], []>} : vector<128x128xf32>, vector<128x16xf32>, vector<128x16xf32> -> vector<128x16xf32>
    %10 = arith.addf %7, %9 : vector<128x16xf32>
    %c0_5 = arith.constant 0 : index
    %c0_6 = arith.constant 0 : index
    %11 = vector.load %arg5[%c0_5, %c0_6] : memref<128x16xf32, #tpu.memory_space<vmem>>, vector<128x16xf32>
    tpu.vector_store %arg5[%c0_5, %c0_6], %10 {strides = array<i32>} : memref<128x16xf32, #tpu.memory_space<vmem>>, vector<128x16xf32>,
    %c0_i32_7 = arith.constant 0 : i32
    %12 = arith.cmpi eq, %arg1, %c0_i32_7 : i32
    %13 = arith.extui %12 : i1 to i32
    %c0_i32_8 = arith.constant 0 : i32
    %14 = arith.cmpi ne, %13, %c0_i32_8 : i32
    scf.if %14 {
      %c0_9 = arith.constant 0 : index
      %c0_10 = arith.constant 0 : index
      %15 = vector.load %arg5[%c0_9, %c0_10] : memref<128x16xf32, #tpu.memory_space<vmem>>, vector<128x16xf32>
      %cst_11 = arith.constant dense<0xFF800000> : vector<128xf32>
      %16 = vector.multi_reduction <maximumf>, %15, %cst_11 [1] : vector<128x16xf32> to vector<128xf32>
      %17 = vector.shape_cast %16 : vector<128xf32> to vector<128x1xf32>
      %18 = vector.broadcast %17 : vector<128x1xf32> to vector<128x16xf32>
      %19 = arith.subf %15, %18 : vector<128x16xf32>
      %20 = math.exp %19 : vector<128x16xf32>
      %cst_12 = arith.constant dense<0.000000e+00> : vector<128xf32>
      %21 = vector.multi_reduction <add>, %20, %cst_12 [1] : vector<128x16xf32> to vector<128xf32>
      %22 = vector.shape_cast %21 : vector<128xf32> to vector<128x1xf32>
      %23 = math.log %22 : vector<128x1xf32>
      %24 = vector.broadcast %23 : vector<128x1xf32> to vector<128x16xf32>
      %25 = arith.subf %19, %24 : vector<128x16xf32>
      %c0_13 = arith.constant 0 : index
      %c0_14 = arith.constant 0 : index
      %26 = vector.load %arg4[%c0_13, %c0_14] : memref<128x16xf32, #tpu.memory_space<vmem>>, vector<128x16xf32>
      tpu.vector_store %arg4[%c0_13, %c0_14], %25 {strides = array<i32>} : memref<128x16xf32, #tpu.memory_space<vmem>>, vector<128x16xf32>,
    } else {
    }
    return
  }
  func.func @transform_0(%arg0: i32, %arg1: i32) -> (i32, i32) {
    %c0_i32 = arith.constant 0 : i32
    return %arg0, %arg1 : i32, i32
  }
  func.func @transform_1(%arg0: i32, %arg1: i32) -> (i32, i32) {
    %c0_i32 = arith.constant 0 : i32
    %c0_i32_0 = arith.constant 0 : i32
    %c0_i32_1 = arith.constant 0 : i32
    return %c0_i32, %c0_i32_0 : i32, i32
  }
  func.func @transform_2(%arg0: i32, %arg1: i32) -> (i32, i32) {
    %c0_i32 = arith.constant 0 : i32
    %c0_i32_0 = arith.constant 0 : i32
    return %arg0, %c0_i32 : i32, i32
  }
}

</mosaic_0001>

<bundles_post_ra>
// kernel: exact1_forward.1
= control target key start
LH: loop header
LB: loop body
LE: loop exit
PB: predicated region body
PF: predicated region fallthrough
CT: control target
= control target key end

     0   :  { %vm15_vm0 = vcmask 130048   ;;  %v692_v3 = vmov 0.0   ;;  %s1036_s1 = inlined_call_operand.vmem [shape: f32[128,16], index: 1, kind: input, shape index: {}]   ;;  %s1037_s0 = inlined_call_operand.vmem [shape: f32[128,128], index: 0, kind: input, shape index: {}]   ;;  %s1038_s2 = inlined_call_operand.vmem [shape: f32[128,16], index: 2, kind: output, shape index: {}]  }
   0x1   :  { %v34_v0 = vld [vmem:[%s1036_s1] sm:$0xff]  ;;  %v35_v1 = vld [vmem:[%s1036_s1 + $0x8] sm:$0xff]  ;;  %v36_v2 = vld [vmem:[%s1036_s1 + $0x10] sm:$0xff]  ;;  %17 = vst.msk [vmem:[#allocation2 + $0x8] sm:$0xff] %vm15_vm0, %v692_v3 }
   0x2   :  { %16 = vst.msk [vmem:[#allocation2] sm:$0xff] %vm15_vm0, %v692_v3  ;;  %18 = vst.msk [vmem:[#allocation2 + $0x10] sm:$0xff] %vm15_vm0, %v692_v3  ;;  %v579_v4 = vpack.c.bf16 %v35_v1, %v34_v0  ;;  %v37_v5 = vld [vmem:[%s1036_s1 + $0x18] sm:$0xff]  ;;  %v38_v7 = vld [vmem:[%s1036_s1 + $0x20] sm:$0xff] }
   0x3   :  { %19 = vst.msk [vmem:[#allocation2 + $0x18] sm:$0xff] %vm15_vm0, %v692_v3  ;;  %20 = vst.msk [vmem:[#allocation2 + $0x20] sm:$0xff] %vm15_vm0, %v692_v3  ;;  %v583_v6 = vpack.c.bf16 %v37_v5, %v36_v2  ;;  %v39_v8 = vld [vmem:[%s1036_s1 + $0x28] sm:$0xff]  ;;  %v66_v10 = vld [vmem:[%s1037_s0] sm:$0xff] }
   0x4   :  { %21 = vst.msk [vmem:[#allocation2 + $0x28] sm:$0xff] %vm15_vm0, %v692_v3  ;;  %22 = vst.msk [vmem:[#allocation2 + $0x30] sm:$0xff] %vm15_vm0, %v692_v3  ;;  %580 = vmatprep.subr.bf16.mxu0 %v579_v4  ;;  %611 = vmatprep.subr.bf16.mxu1 %v579_v4  ;;  %v587_v9 = vpack.c.bf16 %v39_v8, %v38_v7  ;;  %v74_v11 = vld [vmem:[%s1037_s0 + $0x40] sm:$0xff]  ;;  %v40_v12 = vld [vmem:[%s1036_s1 + $0x30] sm:$0xff] }
   0x5   :  { %23 = vst.msk [vmem:[#allocation2 + $0x38] sm:$0xff] %vm15_vm0, %v692_v3  ;;  %24 = vst.msk [vmem:[#allocation2 + $0x40] sm:$0xff] %vm15_vm0, %v692_v3  ;;  %582 = vmatpush3.bf16.msra.mxu0 %v579_v4  ;;  %619 = vmatpush3.bf16.msra.mxu1 %v579_v4  ;;  %v41_v13 = vld [vmem:[%s1036_s1 + $0x38] sm:$0xff]  ;;  %v42_v15 = vld [vmem:[%s1036_s1 + $0x40] sm:$0xff] }
   0x6   :  { %25 = vst.msk [vmem:[#allocation2 + $0x48] sm:$0xff] %vm15_vm0, %v692_v3  ;;  %26 = vst.msk [vmem:[#allocation2 + $0x50] sm:$0xff] %vm15_vm0, %v692_v3  ;;  %584 = vmatprep.subr.bf16.mxu0 %v583_v6  ;;  %612 = vmatprep.subr.bf16.mxu1 %v583_v6  ;;  %v591_v14 = vpack.c.bf16 %v41_v13, %v40_v12  ;;  %v43_v16 = vld [vmem:[%s1036_s1 + $0x48] sm:$0xff]  ;;  %v44_v18 = vld [vmem:[%s1036_s1 + $0x50] sm:$0xff] }
   0x7   :  { %27 = vst.msk [vmem:[#allocation2 + $0x58] sm:$0xff] %vm15_vm0, %v692_v3  ;;  %28 = vst.msk [vmem:[#allocation2 + $0x60] sm:$0xff] %vm15_vm0, %v692_v3  ;;  %555 = vmatprep.mubr.f32.mxu0 %v66_v10  ;;  %567 = vmatprep.mubr.f32.mxu1 %v74_v11  ;;  %v595_v17 = vpack.c.bf16 %v43_v16, %v42_v15  ;;  %v45_v19 = vld [vmem:[%s1036_s1 + $0x58] sm:$0xff]  ;;  %v46_v21 = vld [vmem:[%s1036_s1 + $0x60] sm:$0xff] }
   0x8   :  { %29 = vst.msk [vmem:[#allocation2 + $0x68] sm:$0xff] %vm15_vm0, %v692_v3  ;;  %30 = vst.msk [vmem:[#allocation2 + $0x70] sm:$0xff] %vm15_vm0, %v692_v3  ;;  %v599_v20 = vpack.c.bf16 %v45_v19, %v44_v18  ;;  %v47_v22 = vld [vmem:[%s1036_s1 + $0x68] sm:$0xff]  ;;  %v48_v24 = vld [vmem:[%s1036_s1 + $0x70] sm:$0xff] }
   0x9   :  { %31 = vst.msk [vmem:[#allocation2 + $0x78] sm:$0xff] %vm15_vm0, %v692_v3  ;;  %586 = vmatpush3.bf16.msra.mxu0 %v583_v6  ;;  %620 = vmatpush3.bf16.msra.mxu1 %v583_v6  ;;  %v603_v23 = vpack.c.bf16 %v47_v22, %v46_v21  ;;  %v49_v25 = vld [vmem:[%s1036_s1 + $0x78] sm:$0xff]  ;;  %v67_v27 = vld [vmem:[%s1037_s0 + $0x8] sm:$0xff]  ;;  %v68_v29 = vld [vmem:[%s1037_s0 + $0x10] sm:$0xff] }
   0xa   :  { %588 = vmatprep.subr.bf16.mxu0 %v587_v9  ;;  %613 = vmatprep.subr.bf16.mxu1 %v587_v9  ;;  %v607_v26 = vpack.c.bf16 %v49_v25, %v48_v24  ;;  %v75_v28 = vld [vmem:[%s1037_s0 + $0x48] sm:$0xff]  ;;  %v76_v30 = vld [vmem:[%s1037_s0 + $0x50] sm:$0xff]  ;;  %v69_v31 = vld [vmem:[%s1037_s0 + $0x18] sm:$0xff] }
   0xb   :  { %v77_v32 = vld [vmem:[%s1037_s0 + $0x58] sm:$0xff]  ;;  %v70_v33 = vld [vmem:[%s1037_s0 + $0x20] sm:$0xff]  ;;  %v71_v35 = vld [vmem:[%s1037_s0 + $0x28] sm:$0xff] }
   0xc   :  { %v78_v34 = vld [vmem:[%s1037_s0 + $0x60] sm:$0xff]  ;;  %v79_v36 = vld [vmem:[%s1037_s0 + $0x68] sm:$0xff]  ;;  %v72_v37 = vld [vmem:[%s1037_s0 + $0x30] sm:$0xff] }
   0xd   :  { %590 = vmatpush3.bf16.msra.mxu0 %v587_v9  ;;  %621 = vmatpush3.bf16.msra.mxu1 %v587_v9  ;;  %v80_v38 = vld [vmem:[%s1037_s0 + $0x70] sm:$0xff]  ;;  %v73_v39 = vld [vmem:[%s1037_s0 + $0x38] sm:$0xff]  ;;  %v53_v53 = vld [vmem:[#allocation2 + $0x18] sm:$0xff] }
   0xe   :  { %592 = vmatprep.subr.bf16.mxu0 %v591_v14  ;;  %614 = vmatprep.subr.bf16.mxu1 %v591_v14  ;;  %v81_v40 = vld [vmem:[%s1037_s0 + $0x78] sm:$0xff]  ;;  %v50_v43 = vld [vmem:[#allocation2] sm:$0xff]  ;;  %v61_v54 = vld [vmem:[#allocation2 + $0x58] sm:$0xff] }
   0xf   :  { %v51_v41 = vld [vmem:[#allocation2 + $0x8] sm:$0xff]  ;;  %v58_v44 = vld [vmem:[#allocation2 + $0x40] sm:$0xff]  ;;  %v52_v55 = vld [vmem:[#allocation2 + $0x10] sm:$0xff] }
  0x10   :  { %v59_v42 = vld [vmem:[#allocation2 + $0x48] sm:$0xff]  ;;  %v60_v56 = vld [vmem:[#allocation2 + $0x50] sm:$0xff]  ;;  %v54_v3 = vld [vmem:[#allocation2 + $0x20] sm:$0xff] }
  0x11   :  { %594 = vmatpush3.bf16.msra.mxu0 %v591_v14  ;;  %622 = vmatpush3.bf16.msra.mxu1 %v591_v14  ;;  %v55_v1 = vld [vmem:[#allocation2 + $0x28] sm:$0xff]  ;;  %v62_v4 = vld [vmem:[#allocation2 + $0x60] sm:$0xff]  ;;  %v57_v11 = vld [vmem:[#allocation2 + $0x38] sm:$0xff] }
  0x12   :  { %596 = vmatprep.subr.bf16.mxu0 %v595_v17  ;;  %615 = vmatprep.subr.bf16.mxu1 %v595_v17  ;;  %v63_v2 = vld [vmem:[#allocation2 + $0x68] sm:$0xff]  ;;  %v65_v16 = vld [vmem:[#allocation2 + $0x78] sm:$0xff]  ;;  %v56_v19 = vld [vmem:[#allocation2 + $0x30] sm:$0xff] }
  0x15   :  { %598 = vmatpush3.bf16.msra.mxu0 %v595_v17  ;;  %623 = vmatpush3.bf16.msra.mxu1 %v595_v17 }
  0x16   :  { %600 = vmatprep.subr.bf16.mxu0 %v599_v20  ;;  %616 = vmatprep.subr.bf16.mxu1 %v599_v20 }
  0x19   :  { %602 = vmatpush3.bf16.msra.mxu0 %v599_v20  ;;  %624 = vmatpush3.bf16.msra.mxu1 %v599_v20  ;;  %v64_v20 = vld [vmem:[#allocation2 + $0x70] sm:$0xff] }
  0x1a   :  { %604 = vmatprep.subr.bf16.mxu0 %v603_v23  ;;  %617 = vmatprep.subr.bf16.mxu1 %v603_v23 }
  0x1d   :  { %606 = vmatpush3.bf16.msra.mxu0 %v603_v23  ;;  %625 = vmatpush3.bf16.msra.mxu1 %v603_v23 }
  0x1e   :  { %608 = vmatprep.subr.bf16.mxu0 %v607_v26  ;;  %618 = vmatprep.subr.bf16.mxu1 %v607_v26 }
  0x21   :  { %610 = vmatpush3.bf16.msra.mxu0 %v607_v26  ;;  %626 = vmatpush3.bf16.msra.mxu1 %v607_v26 }
  0x24   :  { %556 = vmatmul.mubr.f32.vlgmr.msra.gmra.mrb[0].mxu0 %v67_v27  ;;  %568 = vmatmul.mubr.f32.vlgmr.msra.gmra.mrb[0].mxu1 %v75_v28 }
  0x25   :  { %558 = vmatprep.mubr.f32.mxu0 %v68_v29  ;;  %570 = vmatprep.mubr.f32.mxu1 %v76_v30 }
  0x28   :  { %559 = vmatmul.mubr.f32.gmra.mrb[2].mxu0 %v69_v31  ;;  %571 = vmatmul.mubr.f32.gmra.mrb[2].mxu1 %v77_v32 }
  0x29   :  { %561 = vmatprep.mubr.f32.mxu0 %v70_v33  ;;  %573 = vmatprep.mubr.f32.mxu1 %v78_v34 }
  0x2c   :  { %562 = vmatmul.mubr.f32.gmra.mrb[4].mxu0 %v71_v35  ;;  %574 = vmatmul.mubr.f32.gmra.mrb[4].mxu1 %v79_v36 }
  0x2d   :  { %564 = vmatprep.mubr.f32.mxu0 %v72_v37  ;;  %576 = vmatprep.mubr.f32.mxu1 %v80_v38 }
  0x30   :  { %565 = vmatmul.mubr.f32.gmra.mrb[6].mxu0 %v73_v39  ;;  %577 = vmatmul.mubr.f32.gmra.mrb[6].mxu1 %v81_v40 }
  0xf7   :  { %v557_v45 = vpop.f32.mrb[0].mxu0  ;;  %v569_v46 = vpop.f32.mrb[0].mxu1 }
  0xf8   :  { %v228_v47 = vadd.f32 %v557_v45, %v51_v41  ;;  %v236_v48 = vadd.f32 %v569_v46, %v59_v42  ;;  %v148_v49 = vpop.f32.mrb[1].mxu0  ;;  %v188_v50 = vpop.f32.mrb[1].mxu1 }
  0xf9   :  { %v227_v51 = vadd.f32 %v148_v49, %v50_v43  ;;  %v235_v52 = vadd.f32 %v188_v50, %v58_v44 }
  0xfa   :  { %245 = vst.msk [vmem:[#allocation2 + $0x8] sm:$0xff] %vm15_vm0, %v228_v47  ;;  %253 = vst.msk [vmem:[#allocation2 + $0x48] sm:$0xff] %vm15_vm0, %v236_v48 }
  0xfb   :  { %244 = vst.msk [vmem:[#allocation2] sm:$0xff] %vm15_vm0, %v227_v51  ;;  %252 = vst.msk [vmem:[#allocation2 + $0x40] sm:$0xff] %vm15_vm0, %v235_v52  ;;  %v560_v57 = vpop.f32.mrb[2].mxu0  ;;  %v572_v58 = vpop.f32.mrb[2].mxu1 }
  0xfc   :  { %v230_v59 = vadd.f32 %v560_v57, %v53_v53  ;;  %v158_v60 = vpop.f32.mrb[3].mxu0  ;;  %v238_v61 = vadd.f32 %v572_v58, %v61_v54  ;;  %v198_v62 = vpop.f32.mrb[3].mxu1 }
  0xfd   :  { %v229_v63 = vadd.f32 %v158_v60, %v52_v55  ;;  %v237_v0 = vadd.f32 %v198_v62, %v60_v56 }
  0xfe   :  { %247 = vst.msk [vmem:[#allocation2 + $0x18] sm:$0xff] %vm15_vm0, %v230_v59  ;;  %255 = vst.msk [vmem:[#allocation2 + $0x58] sm:$0xff] %vm15_vm0, %v238_v61 }
  0xff   :  { %246 = vst.msk [vmem:[#allocation2 + $0x10] sm:$0xff] %vm15_vm0, %v229_v63  ;;  %254 = vst.msk [vmem:[#allocation2 + $0x50] sm:$0xff] %vm15_vm0, %v237_v0  ;;  %v563_v5 = vpop.f32.mrb[4].mxu0  ;;  %v575_v6 = vpop.f32.mrb[4].mxu1 }
 0x100   :  { %v232_v7 = vadd.f32 %v563_v5, %v55_v1  ;;  %v168_v8 = vpop.f32.mrb[5].mxu0  ;;  %v240_v9 = vadd.f32 %v575_v6, %v63_v2  ;;  %v208_v10 = vpop.f32.mrb[5].mxu1 }
 0x101   :  { %v828_v12 = vld [vmem:[#allocation2 + $0x48] sm:$0xff]  ;;  %v231_v14 = vadd.f32 %v168_v8, %v54_v3  ;;  %v239_v15 = vadd.f32 %v208_v10, %v62_v4 }
 0x102   :  { %v830_v13 = vld [vmem:[#allocation2 + $0x8] sm:$0xff]  ;;  %v306_v17 = vsel %vm15_vm0, %v828_v12, -inf  ;;  %249 = vst.msk [vmem:[#allocation2 + $0x28] sm:$0xff] %vm15_vm0, %v232_v7  ;;  %257 = vst.msk [vmem:[#allocation2 + $0x68] sm:$0xff] %vm15_vm0, %v240_v9  ;;  %v838_v21 = vld [vmem:[#allocation2] sm:$0xff] }
 0x103   :  { %v282_v18 = vsel %vm15_vm0, %v830_v13, -inf  ;;  %307 = vmax.xlane.f32.xlu1 %v306_v17  ;;  %248 = vst.msk [vmem:[#allocation2 + $0x20] sm:$0xff] %vm15_vm0, %v231_v14  ;;  %256 = vst.msk [vmem:[#allocation2 + $0x60] sm:$0xff] %vm15_vm0, %v239_v15  ;;  %v566_v22 = vpop.f32.mrb[6].mxu0  ;;  %v578_v23 = vpop.f32.mrb[6].mxu1  ;;  %v279_v32 = vsel %vm15_vm0, %v838_v21, -inf }
 0x104   :  { %283 = vmax.xlane.f32.xlu0 %v282_v18  ;;  %v234_v24 = vadd.f32 %v566_v22, %v57_v11  ;;  %v178_v25 = vpop.f32.mrb[7].mxu0  ;;  %v242_v26 = vadd.f32 %v578_v23, %v65_v16  ;;  %v218_v27 = vpop.f32.mrb[7].mxu1  ;;  %v271_v34 = vld [vmem:[#allocation2 + $0x40] sm:$0xff] }
 0x105   :  { %v266_v28 = vld [vmem:[#allocation2 + $0x18] sm:$0xff]  ;;  %v233_v30 = vadd.f32 %v178_v25, %v56_v19  ;;  %v241_v31 = vadd.f32 %v218_v27, %v64_v20  ;;  %v303_v36 = vsel %vm15_vm0, %v271_v34, -inf }
 0x106   :  { %v842_v29 = vld [vmem:[#allocation2 + $0x58] sm:$0xff]  ;;  %v288_v33 = vsel %vm15_vm0, %v266_v28, -inf  ;;  %251 = vst.msk [vmem:[#allocation2 + $0x38] sm:$0xff] %vm15_vm0, %v234_v24  ;;  %259 = vst.msk [vmem:[#allocation2 + $0x78] sm:$0xff] %vm15_vm0, %v242_v26  ;;  %v273_v37 = vld [vmem:[#allocation2 + $0x50] sm:$0xff] }
 0x107   :  { %289 = vmax.xlane.f32.xlu1 %v288_v33  ;;  %250 = vst.msk [vmem:[#allocation2 + $0x30] sm:$0xff] %vm15_vm0, %v233_v30  ;;  %258 = vst.msk [vmem:[#allocation2 + $0x70] sm:$0xff] %vm15_vm0, %v241_v31  ;;  %v312_v35 = vsel %vm15_vm0, %v842_v29, -inf  ;;  %v265_v38 = vld [vmem:[#allocation2 + $0x10] sm:$0xff]  ;;  %v309_v41 = vsel %vm15_vm0, %v273_v37, -inf }
 0x108   :  { %280 = vmax.xlane.f32.xlu0 %v279_v32  ;;  %v285_v42 = vsel %vm15_vm0, %v265_v38, -inf }
 0x109   :  { %v268_v39 = vld [vmem:[#allocation2 + $0x28] sm:$0xff] }
 0x10a   :  { %v267_v40 = vld [vmem:[#allocation2 + $0x20] sm:$0xff]  ;;  %v294_v43 = vsel %vm15_vm0, %v268_v39, -inf  ;;  %v858_v45 = vld [vmem:[#allocation2 + $0x68] sm:$0xff] }
 0x10b   :  { %313 = vmax.xlane.f32.xlu1 %v312_v35  ;;  %v291_v44 = vsel %vm15_vm0, %v267_v40, -inf  ;;  %v860_v46 = vld [vmem:[#allocation2 + $0x60] sm:$0xff]  ;;  %v318_v47 = vsel %vm15_vm0, %v858_v45, -inf }
 0x10c   :  { %304 = vmax.xlane.f32.xlu0 %v303_v36  ;;  %v315_v48 = vsel %vm15_vm0, %v860_v46, -inf }
 0x10d   :  { %v866_v49 = vld [vmem:[#allocation2 + $0x38] sm:$0xff] }
 0x10e   :  { %v868_v50 = vld [vmem:[#allocation2 + $0x30] sm:$0xff]  ;;  %v300_v51 = vsel %vm15_vm0, %v866_v49, -inf  ;;  %v874_v53 = vld [vmem:[#allocation2 + $0x78] sm:$0xff] }
 0x10f   :  { %286 = vmax.xlane.f32.xlu1 %v285_v42  ;;  %v297_v52 = vsel %vm15_vm0, %v868_v50, -inf  ;;  %v876_v54 = vld [vmem:[#allocation2 + $0x70] sm:$0xff]  ;;  %v324_v55 = vsel %vm15_vm0, %v874_v53, -inf }
 0x110   :  { %310 = vmax.xlane.f32.xlu0 %v309_v41  ;;  %v321_v56 = vsel %vm15_vm0, %v876_v54, -inf }
 0x113   :  { %295 = vmax.xlane.f32.xlu1 %v294_v43 }
 0x114   :  { %292 = vmax.xlane.f32.xlu0 %v291_v44 }
 0x117   :  { %319 = vmax.xlane.f32.xlu1 %v318_v47 }
 0x118   :  { %316 = vmax.xlane.f32.xlu0 %v315_v48 }
 0x11b   :  { %301 = vmax.xlane.f32.xlu1 %v300_v51 }
 0x11c   :  { %298 = vmax.xlane.f32.xlu0 %v297_v52 }
 0x11f   :  { %325 = vmax.xlane.f32.xlu1 %v324_v55 }
 0x120   :  { %322 = vmax.xlane.f32.xlu0 %v321_v56 }
 0x190   :  { %v308_v57 = vpop.xlane.xlu1 %307 }
 0x191   :  { %v284_v58 = vpop.xlane.xlu0 %283  ;;  %v883_v59 = vsub.f32 %v828_v12, %v308_v57 }
 0x192   :  { %v886_v60 = vsub.f32 %v830_v13, %v284_v58 }
 0x193   :  { %v361_v62 = vmul.f32 1.442695, %v883_v59 }
 0x194   :  { %v345_v61 = vmul.f32 1.442695, %v886_v60  ;;  %v290_v0 = vpop.xlane.xlu1 %289 }
 0x195   :  { %v281_v63 = vpop.xlane.xlu0 %280  ;;  %v893_v2 = vsub.f32 %v266_v28, %v290_v0 }
 0x196   :  { %v891_v1 = vsub.f32 %v838_v21, %v281_v63  ;;  %628 = vpow2.f32 %v345_v61 }
 0x197   :  { %630 = vpow2.f32 %v361_v62  ;;  %v349_v4 = vmul.f32 1.442695, %v893_v2 }
 0x198   :  { %v343_v3 = vmul.f32 1.442695, %v891_v1  ;;  %v314_v6 = vpop.xlane.xlu1 %313 }
 0x199   :  { %v305_v5 = vpop.xlane.xlu0 %304  ;;  %v900_v8 = vsub.f32 %v842_v29, %v314_v6 }
 0x19a   :  { %632 = vpow2.f32 %v343_v3  ;;  %v897_v7 = vsub.f32 %v271_v34, %v305_v5 }
 0x19b   :  { %v365_v10 = vmul.f32 1.442695, %v900_v8  ;;  %634 = vpow2.f32 %v349_v4 }
 0x19c   :  { %v359_v9 = vmul.f32 1.442695, %v897_v7  ;;  %v287_v12 = vpop.xlane.xlu1 %286 }
 0x19d   :  { %v311_v11 = vpop.xlane.xlu0 %310  ;;  %v906_v14 = vsub.f32 %v265_v38, %v287_v12 }
 0x19e   :  { %636 = vpow2.f32 %v359_v9  ;;  %v904_v13 = vsub.f32 %v273_v37, %v311_v11 }
 0x19f   :  { %638 = vpow2.f32 %v365_v10  ;;  %v347_v15 = vmul.f32 1.442695, %v906_v14 }
 0x1a0   :  { %v629_v16 = vpop.eup %628  ;;  %v363_v17 = vmul.f32 1.442695, %v904_v13  ;;  %v296_v18 = vpop.xlane.xlu1 %295 }
 0x1a1   :  { %v293_v19 = vpop.xlane.xlu0 %292  ;;  %v910_v20 = vsub.f32 %v268_v39, %v296_v18  ;;  %v378_v22 = vsel %vm15_vm0, %v629_v16, 0.0  ;;  %v631_v23 = vpop.eup %630  ;;  %640 = vpow2.f32 %v347_v15 }
 0x1a2   :  { %v912_v21 = vsub.f32 %v267_v40, %v293_v19  ;;  %379 = vadd.xlane.f32.xlu1 %v378_v22  ;;  %642 = vpow2.f32 %v363_v17  ;;  %v402_v32 = vsel %vm15_vm0, %v631_v23, 0.0 }
 0x1a3   :  { %v353_v25 = vmul.f32 1.442695, %v910_v20 }
 0x1a4   :  { %v633_v24 = vpop.eup %632  ;;  %v351_v26 = vmul.f32 1.442695, %v912_v21  ;;  %v320_v27 = vpop.xlane.xlu1 %319 }
 0x1a5   :  { %v317_v28 = vpop.xlane.xlu0 %316  ;;  %v375_v29 = vsel %vm15_vm0, %v633_v24, 0.0  ;;  %644 = vpow2.f32 %v353_v25  ;;  %v919_v30 = vsub.f32 %v858_v45, %v320_v27  ;;  %v635_v33 = vpop.eup %634 }
 0x1a6   :  { %v922_v31 = vsub.f32 %v860_v46, %v317_v28  ;;  %376 = vadd.xlane.f32.xlu0 %v375_v29  ;;  %403 = vadd.xlane.f32.xlu1 %v402_v32  ;;  %646 = vpow2.f32 %v351_v26  ;;  %v384_v43 = vsel %vm15_vm0, %v635_v33, 0.0 }
 0x1a7   :  { %v369_v35 = vmul.f32 1.442695, %v919_v30 }
 0x1a8   :  { %v637_v34 = vpop.eup %636  ;;  %v367_v36 = vmul.f32 1.442695, %v922_v31  ;;  %v302_v37 = vpop.xlane.xlu1 %301 }
 0x1a9   :  { %v299_v38 = vpop.xlane.xlu0 %298  ;;  %v399_v39 = vsel %vm15_vm0, %v637_v34, 0.0  ;;  %v639_v40 = vpop.eup %638  ;;  %648 = vpow2.f32 %v369_v35  ;;  %v929_v41 = vsub.f32 %v866_v49, %v302_v37 }
 0x1aa   :  { %v932_v42 = vsub.f32 %v868_v50, %v299_v38  ;;  %400 = vadd.xlane.f32.xlu0 %v399_v39  ;;  %385 = vadd.xlane.f32.xlu1 %v384_v43  ;;  %650 = vpow2.f32 %v367_v36  ;;  %v408_v51 = vsel %vm15_vm0, %v639_v40, 0.0 }
 0x1ab   :  { %v357_v44 = vmul.f32 1.442695, %v929_v41  ;;  %v641_v45 = vpop.eup %640 }
 0x1ac   :  { %v355_v46 = vmul.f32 1.442695, %v932_v42  ;;  %v326_v47 = vpop.xlane.xlu1 %325  ;;  %v381_v52 = vsel %vm15_vm0, %v641_v45, 0.0  ;;  %v643_v55 = vpop.eup %642 }
 0x1ad   :  { %v323_v48 = vpop.xlane.xlu0 %322  ;;  %652 = vpow2.f32 %v357_v44  ;;  %v939_v49 = vsub.f32 %v874_v53, %v326_v47  ;;  %v405_v53 = vsel %vm15_vm0, %v643_v55, 0.0 }
 0x1ae   :  { %v942_v50 = vsub.f32 %v876_v54, %v323_v48  ;;  %409 = vadd.xlane.f32.xlu1 %v408_v51  ;;  %382 = vadd.xlane.f32.xlu0 %v381_v52  ;;  %654 = vpow2.f32 %v355_v46 }
 0x1af   :  { %v645_v56 = vpop.eup %644  ;;  %v373_v57 = vmul.f32 1.442695, %v939_v49 }
 0x1b0   :  { %v371_v58 = vmul.f32 1.442695, %v942_v50  ;;  %v390_v61 = vsel %vm15_vm0, %v645_v56, 0.0  ;;  %v647_v62 = vpop.eup %646 }
 0x1b1   :  { %656 = vpow2.f32 %v373_v57  ;;  %v387_v0 = vsel %vm15_vm0, %v647_v62, 0.0 }
 0x1b2   :  { %391 = vadd.xlane.f32.xlu1 %v390_v61  ;;  %406 = vadd.xlane.f32.xlu0 %v405_v53  ;;  %658 = vpow2.f32 %v371_v58 }
 0x1b3   :  { %v649_v54 = vpop.eup %648 }
 0x1b4   :  { %v414_v63 = vsel %vm15_vm0, %v649_v54, 0.0  ;;  %v651_v3 = vpop.eup %650 }
 0x1b5   :  { %v411_v6 = vsel %vm15_vm0, %v651_v3, 0.0 }
 0x1b6   :  { %415 = vadd.xlane.f32.xlu1 %v414_v63  ;;  %388 = vadd.xlane.f32.xlu0 %v387_v0 }
 0x1b7   :  { %v653_v4 = vpop.eup %652 }
 0x1b8   :  { %v396_v5 = vsel %vm15_vm0, %v653_v4, 0.0  ;;  %v655_v9 = vpop.eup %654 }
 0x1b9   :  { %v393_v12 = vsel %vm15_vm0, %v655_v9, 0.0 }
 0x1ba   :  { %397 = vadd.xlane.f32.xlu1 %v396_v5  ;;  %412 = vadd.xlane.f32.xlu0 %v411_v6 }
 0x1bb   :  { %v657_v10 = vpop.eup %656 }
 0x1bc   :  { %v420_v11 = vsel %vm15_vm0, %v657_v10, 0.0  ;;  %v659_v15 = vpop.eup %658 }
 0x1bd   :  { %v417_v16 = vsel %vm15_vm0, %v659_v15, 0.0 }
 0x1be   :  { %421 = vadd.xlane.f32.xlu1 %v420_v11  ;;  %394 = vadd.xlane.f32.xlu0 %v393_v12 }
 0x1c2   :  { %418 = vadd.xlane.f32.xlu0 %v417_v16 }
 0x22f   :  { %v380_v17 = vpop.xlane.xlu1 %379 }
 0x230   :  { %660 = vlog2.f32 %v380_v17 }
 0x233   :  { %v377_v18 = vpop.xlane.xlu0 %376  ;;  %v404_v19 = vpop.xlane.xlu1 %403 }
 0x234   :  { %662 = vlog2.f32 %v377_v18 }
 0x235   :  { %664 = vlog2.f32 %v404_v19 }
 0x237   :  { %v401_v22 = vpop.xlane.xlu0 %400  ;;  %v386_v23 = vpop.xlane.xlu1 %385 }
 0x238   :  { %666 = vlog2.f32 %v401_v22 }
 0x239   :  { %668 = vlog2.f32 %v386_v23 }
 0x23a   :  { %v661_v24 = vpop.eup %660 }
 0x23b   :  { %v426_v25 = vmul.f32 0.6931472, %v661_v24  ;;  %v410_v26 = vpop.xlane.xlu1 %409  ;;  %v383_v27 = vpop.xlane.xlu0 %382 }
 0x23c   :  { %670 = vlog2.f32 %v410_v26 }
 0x23d   :  { %v456_v29 = vsub.f32 %v886_v60, %v426_v25  ;;  %672 = vlog2.f32 %v383_v27 }
 0x23e   :  { %v663_v28 = vpop.eup %662 }
 0x23f   :  { %v665_v32 = vpop.eup %664  ;;  %v424_v33 = vmul.f32 0.6931472, %v663_v28  ;;  %472 = vst.msk [vmem:[%s1038_s2 + $0x8] sm:$0xff] %vm15_vm0, %v456_v29  ;;  %v392_v35 = vpop.xlane.xlu1 %391 }
 0x240   :  { %v442_v34 = vmul.f32 0.6931472, %v665_v32  ;;  %v407_v36 = vpop.xlane.xlu0 %406  ;;  %674 = vlog2.f32 %v392_v35 }
 0x241   :  { %v455_v37 = vsub.f32 %v891_v1, %v424_v33  ;;  %676 = vlog2.f32 %v407_v36 }
 0x242   :  { %v667_v38 = vpop.eup %666  ;;  %v464_v39 = vsub.f32 %v883_v59, %v442_v34 }
 0x243   :  { %v669_v40 = vpop.eup %668  ;;  %471 = vst.msk [vmem:[%s1038_s2] sm:$0xff] %vm15_vm0, %v455_v37  ;;  %v440_v60 = vmul.f32 0.6931472, %v667_v38  ;;  %v416_v44 = vpop.xlane.xlu1 %415 }
 0x244   :  { %480 = vst.msk [vmem:[%s1038_s2 + $0x48] sm:$0xff] %vm15_vm0, %v464_v39  ;;  %v430_v43 = vmul.f32 0.6931472, %v669_v40  ;;  %v389_v1 = vpop.xlane.xlu0 %388  ;;  %678 = vlog2.f32 %v416_v44 }
 0x245   :  { %v463_v45 = vsub.f32 %v897_v7, %v440_v60  ;;  %680 = vlog2.f32 %v389_v1 }
 0x246   :  { %v458_v59 = vsub.f32 %v893_v2, %v430_v43  ;;  %v671_v46 = vpop.eup %670 }
 0x247   :  { %479 = vst.msk [vmem:[%s1038_s2 + $0x40] sm:$0xff] %vm15_vm0, %v463_v45  ;;  %v673_v47 = vpop.eup %672  ;;  %v446_v48 = vmul.f32 0.6931472, %v671_v46  ;;  %v398_v51 = vpop.xlane.xlu1 %397 }
 0x248   :  { %474 = vst.msk [vmem:[%s1038_s2 + $0x18] sm:$0xff] %vm15_vm0, %v458_v59  ;;  %v413_v52 = vpop.xlane.xlu0 %412  ;;  %v428_v7 = vmul.f32 0.6931472, %v673_v47  ;;  %682 = vlog2.f32 %v398_v51 }
 0x249   :  { %v466_v2 = vsub.f32 %v900_v8, %v446_v48  ;;  %684 = vlog2.f32 %v413_v52 }
 0x24a   :  { %v675_v55 = vpop.eup %674  ;;  %v457_v56 = vsub.f32 %v906_v14, %v428_v7 }
 0x24b   :  { %v677_v57 = vpop.eup %676  ;;  %482 = vst.msk [vmem:[%s1038_s2 + $0x58] sm:$0xff] %vm15_vm0, %v466_v2  ;;  %v434_v58 = vmul.f32 0.6931472, %v675_v55  ;;  %v422_v61 = vpop.xlane.xlu1 %421 }
 0x24c   :  { %v395_v53 = vpop.xlane.xlu0 %394  ;;  %473 = vst.msk [vmem:[%s1038_s2 + $0x10] sm:$0xff] %vm15_vm0, %v457_v56  ;;  %v444_v62 = vmul.f32 0.6931472, %v677_v57  ;;  %686 = vlog2.f32 %v422_v61 }
 0x24d   :  { %v460_v8 = vsub.f32 %v910_v20, %v434_v58  ;;  %688 = vlog2.f32 %v395_v53 }
 0x24e   :  { %v679_v14 = vpop.eup %678  ;;  %v465_v54 = vsub.f32 %v904_v13, %v444_v62 }
 0x24f   :  { %v681_v63 = vpop.eup %680  ;;  %476 = vst.msk [vmem:[%s1038_s2 + $0x28] sm:$0xff] %vm15_vm0, %v460_v8  ;;  %v450_v0 = vmul.f32 0.6931472, %v679_v14 }
 0x250   :  { %v419_v3 = vpop.xlane.xlu0 %418  ;;  %481 = vst.msk [vmem:[%s1038_s2 + $0x50] sm:$0xff] %vm15_vm0, %v465_v54  ;;  %v432_v4 = vmul.f32 0.6931472, %v681_v63 }
 0x251   :  { %690 = vlog2.f32 %v419_v3  ;;  %v468_v20 = vsub.f32 %v919_v30, %v450_v0 }
 0x252   :  { %v683_v5 = vpop.eup %682  ;;  %v459_v13 = vsub.f32 %v912_v21, %v432_v4 }
 0x253   :  { %v685_v6 = vpop.eup %684  ;;  %484 = vst.msk [vmem:[%s1038_s2 + $0x68] sm:$0xff] %vm15_vm0, %v468_v20  ;;  %v438_v9 = vmul.f32 0.6931472, %v683_v5 }
 0x254   :  { %475 = vst.msk [vmem:[%s1038_s2 + $0x20] sm:$0xff] %vm15_vm0, %v459_v13  ;;  %v448_v10 = vmul.f32 0.6931472, %v685_v6 }
 0x255   :  { %v462_v11 = vsub.f32 %v929_v41, %v438_v9 }
 0x256   :  { %v687_v12 = vpop.eup %686  ;;  %v467_v30 = vsub.f32 %v922_v31, %v448_v10 }
 0x257   :  { %v689_v15 = vpop.eup %688  ;;  %478 = vst.msk [vmem:[%s1038_s2 + $0x38] sm:$0xff] %vm15_vm0, %v462_v11  ;;  %v454_v21 = vmul.f32 0.6931472, %v687_v12 }
 0x258   :  { %483 = vst.msk [vmem:[%s1038_s2 + $0x60] sm:$0xff] %vm15_vm0, %v467_v30  ;;  %v436_v16 = vmul.f32 0.6931472, %v689_v15 }
 0x259   :  { %v470_v17 = vsub.f32 %v939_v49, %v454_v21 }
 0x25a   :  { %v461_v41 = vsub.f32 %v932_v42, %v436_v16 }
 0x25b   :  { %v691_v18 = vpop.eup %690  ;;  %486 = vst.msk [vmem:[%s1038_s2 + $0x78] sm:$0xff] %vm15_vm0, %v470_v17 }
 0x25c   :  { %v452_v31 = vmul.f32 0.6931472, %v691_v18  ;;  %477 = vst.msk [vmem:[%s1038_s2 + $0x30] sm:$0xff] %vm15_vm0, %v461_v41 }
 0x25e   :  { %v469_v19 = vsub.f32 %v942_v50, %v452_v31 }
 0x260   :  { %485 = vst.msk [vmem:[%s1038_s2 + $0x70] sm:$0xff] %vm15_vm0, %v469_v19 }

</bundles_post_ra>
